<compile_context>
chip_gen: v5e
topology: v5e:2x2
jax: 0.10.0
libtpu: 0.0.40
codegen_flags: <defaults>
</compile_context>

<pallas_src>
import functools

import jax
import jax.numpy as jnp
from jax.experimental import pallas as pl
from jax.experimental.pallas import tpu as pltpu

LANE = 128  # lane-dense output slab width


# ----------------------------------------------------------------------------
# Kernel 1: fc head (joint-encode path): score = pooler @ W^T + b,  W: [1, H]
#   A matmul with N=1 wastes 255/256 MXU columns; do a VPU multiply + lane
#   reduce instead.
# ----------------------------------------------------------------------------
def _fc_kernel(x_ref, w_ref, b_ref, o_ref):
    score = jnp.sum(x_ref[...] * w_ref[...], axis=-1, keepdims=True) + b_ref[...]
    o_ref[...] = jnp.broadcast_to(score, o_ref.shape)


def fc_head(x, w_row, b):
    B, H = x.shape
    out = pl.pallas_call(
        _fc_kernel,
        out_shape=jax.ShapeDtypeStruct((B, LANE), jnp.float32),
        grid=(1,),
        in_specs=[
            pl.BlockSpec((B, H), lambda i: (0, 0)),
            pl.BlockSpec((1, H), lambda i: (0, 0)),
            pl.BlockSpec((1, 1), lambda i: (0, 0)),
        ],
        out_specs=pl.BlockSpec((B, LANE), lambda i: (0, 0)),
        compiler_params=pltpu.CompilerParams(dimension_semantics=("arbitrary",)),
    )(x, w_row, b)
    return out[:, :1]


# ----------------------------------------------------------------------------
# Kernel 2: cosine similarity only (separateEncode=True, use_lscore=False)
# ----------------------------------------------------------------------------
def _cosine_kernel(a_ref, s_ref, o_ref):
    a = a_ref[...]
    s = s_ref[...]
    dot = jnp.sum(a * s, axis=-1, keepdims=True)
    na = jnp.sqrt(jnp.sum(a * a, axis=-1, keepdims=True))
    ns = jnp.sqrt(jnp.sum(s * s, axis=-1, keepdims=True))
    cos = dot / jnp.maximum(na * ns, 1e-8)
    o_ref[...] = jnp.broadcast_to(cos, o_ref.shape)


def cosine_score(a, s):
    B, H = a.shape
    out = pl.pallas_call(
        _cosine_kernel,
        out_shape=jax.ShapeDtypeStruct((B, LANE), jnp.float32),
        grid=(1,),
        in_specs=[
            pl.BlockSpec((B, H), lambda i: (0, 0)),
            pl.BlockSpec((B, H), lambda i: (0, 0)),
        ],
        out_specs=pl.BlockSpec((B, LANE), lambda i: (0, 0)),
        compiler_params=pltpu.CompilerParams(dimension_semantics=("arbitrary",)),
    )(a, s)
    return out[:, :1]


# ----------------------------------------------------------------------------
# Kernel 3a: GELU prologue (hoisted out of the vocab stream).
#   z = GELU(hidden @ W1 + b1), written in bf16 for the bf16-LHS W2 matmul.
#   Done once; keeping it in its own launch means hidden/W1/b1 do not occupy
#   VMEM for the whole vocab stream (v7x 64 MiB budget).
# ----------------------------------------------------------------------------
def _gelu_proj_kernel(h_ref, w1_ref, b1_ref, z_ref):
    z = jnp.dot(h_ref[...], w1_ref[...], preferred_element_type=jnp.float32)
    z = z + b1_ref[...]
    # exact (erf) GELU, matching torch nn.GELU() default
    z_ref[...] = jax.nn.gelu(z, approximate=False).astype(z_ref.dtype)


# ----------------------------------------------------------------------------
# Kernel 3b: fused separate-encode path with l_score (cosine + l_score + add)
#   grid = (ceil(V / tv),)  — vocab tiles, marked "arbitrary" (online reduction).
#   Scratch: running max / sum-exp / gathered-logit accumulators [B*S, 1].
#   W2/b2 are streamed bf16 tile-by-tile; z is a bf16 grid-invariant input.
#   P3-style init/finalize with pl.when.  Padded vocab lanes (V not a multiple
#   of tv) are masked before the logsumexp.
# ----------------------------------------------------------------------------
def _lscore_stream_kernel(a_ref, s_ref, z_ref, ids_ref, mask_ref,
                          w2_ref, b2_ref,
                          o_ref, m_ref, l_ref, g_ref, *, v_total):
    v = pl.program_id(0)
    nv = pl.num_programs(0)
    tv = w2_ref.shape[-1]

    @pl.when(v == 0)
    def _init():
        m_ref[...] = jnp.full(m_ref.shape, -jnp.inf, dtype=jnp.float32)
        l_ref[...] = jnp.zeros(l_ref.shape, dtype=jnp.float32)
        g_ref[...] = jnp.zeros(g_ref.shape, dtype=jnp.float32)

    # logits for this vocab tile: [B*S, tv]; bf16 inputs, f32 accumulation
    logits = jnp.dot(z_ref[...], w2_ref[...], preferred_element_type=jnp.float32)
    logits = logits + b2_ref[...].astype(jnp.float32)

    # local lane index within the tile (no global + v*tv adds on the VPU)
    lane = jax.lax.broadcasted_iota(jnp.int32, (1, tv), 1)

    # mask padded vocab columns (V not a multiple of tv) before the logsumexp;
    # use a large-negative instead of -inf to avoid inf-inf NaNs.
    n_valid = v_total - v * tv
    logits_m = jnp.where(lane < n_valid, logits, -1e30)

    # --- online logsumexp over the vocab axis ---
    m_prev = m_ref[...]
    m_new = jnp.maximum(m_prev, jnp.max(logits_m, axis=-1, keepdims=True))
    l_ref[...] = (l_ref[...] * jnp.exp(m_prev - m_new)
                  + jnp.sum(jnp.exp(logits_m - m_new), axis=-1, keepdims=True))
    m_ref[...] = m_new

    # --- gather the raw logit at input_ids (only within this vocab tile) ---
    rel = ids_ref[...] - v * tv                      # [B*S, 1]
    hit = lane == rel                                # [B*S, tv] (broadcast)
    g_ref[...] += jnp.sum(jnp.where(hit, logits, 0.0), axis=-1, keepdims=True)

    @pl.when(v == nv - 1)
    def _finalize():
        B, S = mask_ref.shape
        BS = ids_ref.shape[0]
        # gathered log-prob per row = gathered logit - logsumexp (no [.,V] logp)
        logp_id = g_ref[...] - (m_ref[...] + jnp.log(l_ref[...]))        # [B*S, 1]

        # Per-batch sum over the S rows of each sequence, expressed as a tiny
        # [B, B*S] @ [B*S, 1] matmul (avoids an in-kernel reshape/relayout).
        # NOTE: matches the PyTorch reference — the numerator is NOT masked,
        # only the denominator uses attention_mask.
        col = jax.lax.broadcasted_iota(jnp.int32, (B, BS), 1)
        row = jax.lax.broadcasted_iota(jnp.int32, (B, BS), 0)
        seg = jnp.logical_and(col >= row * S, col < (row + 1) * S).astype(jnp.float32)
        num = jnp.dot(seg, logp_id, preferred_element_type=jnp.float32)  # [B, 1]
        den = jnp.sum(mask_ref[...], axis=-1, keepdims=True)             # [B, 1]
        lsc = (num / den + 200.0) / 100.0

        # cosine similarity of the pooled vectors (fused — no extra launch /
        # HBM round-trip of a (B,1) tensor)
        a = a_ref[...]
        s = s_ref[...]
        dot = jnp.sum(a * s, axis=-1, keepdims=True)
        na = jnp.sqrt(jnp.sum(a * a, axis=-1, keepdims=True))
        ns = jnp.sqrt(jnp.sum(s * s, axis=-1, keepdims=True))
        cos = dot / jnp.maximum(na * ns, 1e-8)

        o_ref[...] = jnp.broadcast_to(cos + lsc, o_ref.shape)


def separate_score_fused(article_pool, summary_pool, hidden, input_ids, attn_mask,
                         w1, b1, w2, b2, *, tv=512):
    """Fused cosine + l_score; vocab streamed in (padded) tiles of width tv."""
    B, S, H = hidden.shape
    V = w2.shape[-1]
    BS = B * S
    nv = (V + tv - 1) // tv
    v_pad = nv * tv

    h_flat = hidden.reshape(BS, H).astype(jnp.float32)
    ids_flat = input_ids.reshape(BS, 1).astype(jnp.int32)
    b1r = b1.reshape(1, H).astype(jnp.float32)

    # Pad the vocab axis up to a multiple of tv and stream W2/b2 in bf16
    # (vocab loop is W2-HBM-bound; bf16 halves traffic, MXU-native input type;
    #  padded columns are masked in-kernel before the logsumexp).
    w2p = jnp.pad(w2, ((0, 0), (0, v_pad - V))).astype(jnp.bfloat16)
    b2p = jnp.pad(b2, (0, v_pad - V)).reshape(1, v_pad).astype(jnp.bfloat16)

    # ---- stage 1: GELU prologue (own launch; z cached in bf16) ----
    z = pl.pallas_call(
        _gelu_proj_kernel,
        out_shape=jax.ShapeDtypeStruct((BS, H), jnp.bfloat16),
        grid=(1,),
        in_specs=[
            pl.BlockSpec((BS, H), lambda i: (0, 0)),
            pl.BlockSpec((H, H), lambda i: (0, 0)),
            pl.BlockSpec((1, H), lambda i: (0, 0)),
        ],
        out_specs=pl.BlockSpec((BS, H), lambda i: (0, 0)),
        compiler_params=pltpu.CompilerParams(dimension_semantics=("arbitrary",)),
    )(h_flat, w1, b1r)

    kernel = functools.partial(_lscore_stream_kernel, v_total=V)

    # ---- stage 2: vocab-streamed fused kernel ----
    def _run(use_buffer_hints):
        def spec(shape, index_map, bufs):
            if use_buffer_hints and bufs is not None:
                return pl.BlockSpec(shape, index_map, pipeline_mode=pl.Buffered(bufs))
            return pl.BlockSpec(shape, index_map)

        in_specs = [
            spec((B, H), lambda v: (0, 0), 1),    # article pooler   (invariant)
            spec((B, H), lambda v: (0, 0), 1),    # summary pooler   (invariant)
            spec((BS, H), lambda v: (0, 0), 1),   # z = GELU(...) bf16 (invariant)
            spec((BS, 1), lambda v: (0, 0), 1),   # input ids        (invariant)
            spec((B, S), lambda v: (0, 0), 1),    # attention mask   (invariant)
            spec((H, tv), lambda v: (0, v), 3),   # W2 vocab tile    (streamed, 3-deep)
            spec((1, tv), lambda v: (0, v), 3),   # b2 vocab tile    (streamed, 3-deep)
        ]
        out = pl.pallas_call(
            kernel,
            out_shape=jax.ShapeDtypeStruct((B, LANE), jnp.float32),
            grid=(nv,),
            in_specs=in_specs,
            out_specs=pl.BlockSpec((B, LANE), lambda v: (0, 0)),
            scratch_shapes=[
                pltpu.VMEM((BS, 1), jnp.float32),   # running max
                pltpu.VMEM((BS, 1), jnp.float32),   # running sum-exp
                pltpu.VMEM((BS, 1), jnp.float32),   # gathered-logit accumulator
            ],
            compiler_params=pltpu.CompilerParams(
                dimension_semantics=("arbitrary",),
                # above v5e/v6e scoped defaults (16/32 MiB), below v7x 64 MiB physical
                vmem_limit_bytes=48 * 1024 * 1024,
            ),
        )(article_pool, summary_pool, z, ids_flat, attn_mask, w2p, b2p)
        return jax.block_until_ready(out)

    try:
        out = _run(True)
    except Exception:
        # pipeline_mode buffering hints not supported by this jax build —
        # fall back to default double-buffering (functionally identical).
        out = _run(False)
    return out[:, :1]


# ----------------------------------------------------------------------------
# Scorer wrapper (parameters initialized deterministically in-script).
# ----------------------------------------------------------------------------
class ScorerPallas:
    def __init__(self, key, hidden_size=32, vocab_size=256,
                 separateEncode=False, use_pooler=True, use_lscore=False,
                 vocab_tile=512):
        self.separateEncode = separateEncode
        self.use_pooler = use_pooler
        self.use_lscore = use_lscore
        self.hidden_size = hidden_size
        self.vocab_size = vocab_size
        self.vocab_tile = vocab_tile

        k_fc_w, k_fc_b, k_w1, k_b1, k_w2, k_b2 = jax.random.split(key, 6)
        s = 1.0 / jnp.sqrt(jnp.float32(hidden_size))
        # fc: Linear(hidden, 1) — stored as a [1, H] row vector (torch layout)
        self.fc_w = (jax.random.normal(k_fc_w, (1, hidden_size)) * s).astype(jnp.float32)
        self.fc_b = (jax.random.normal(k_fc_b, (1, 1)) * s).astype(jnp.float32)
        # decoder_l: Linear(H,H) -> GELU -> Linear(H,V)
        self.w1 = (jax.random.normal(k_w1, (hidden_size, hidden_size)) * s).astype(jnp.float32)
        self.b1 = (jax.random.normal(k_b1, (hidden_size,)) * s).astype(jnp.float32)
        self.w2 = (jax.random.normal(k_w2, (hidden_size, vocab_size)) * s).astype(jnp.float32)
        self.b2 = (jax.random.normal(k_b2, (vocab_size,)) * s).astype(jnp.float32)

    def forward_joint(self, pooler_output):
        # separateEncode=False path: x = self.fc(outputs.pooler_output)
        return fc_head(pooler_output, self.fc_w, self.fc_b)

    def forward_separate(self, article_pooler, summary_pooler,
                         summary_hidden, input_ids, attention_mask):
        # separateEncode=True path: x = s_score(...) [+ l_score(...)], fused
        if self.use_lscore:
            return separate_score_fused(article_pooler, summary_pooler,
                                        summary_hidden, input_ids, attention_mask,
                                        self.w1, self.b1, self.w2, self.b2,
                                        tv=self.vocab_tile)
        return cosine_score(article_pooler, summary_pooler)


if __name__ == "__main__":
    # V=300 is deliberately NOT a multiple of the vocab tile: exercises both
    # the streamed (tv=128 -> 3 tiles, padded tail) and single padded tile
    # (tv=512 default) code paths.
    B, S, H, V = 2, 8, 32, 300
    key = jax.random.PRNGKey(0)
    kp, ka, ks, kh, ki = jax.random.split(key, 5)

    # synthetic BERT encoder outputs
    pooler_joint = jax.random.normal(kp, (B, H), dtype=jnp.float32)
    article_pool = jax.random.normal(ka, (B, H), dtype=jnp.float32)
    summary_pool = jax.random.normal(ks, (B, H), dtype=jnp.float32)
    summary_hid = jax.random.normal(kh, (B, S, H), dtype=jnp.float32)
    input_ids = jax.random.randint(ki, (B, S), 0, V, dtype=jnp.int32)
    attn_mask = jnp.ones((B, S), dtype=jnp.float32)

    # --- joint path (separateEncode=False): fc(pooler) ---
    scorer = ScorerPallas(jax.random.PRNGKey(42), hidden_size=H, vocab_size=V)
    out_joint = jax.block_until_ready(scorer.forward_joint(pooler_joint))
    assert out_joint.shape == (B, 1)

    # --- separate path without l_score: cosine only ---
    scorer_cos = ScorerPallas(jax.random.PRNGKey(42), hidden_size=H, vocab_size=V,
                              separateEncode=True, use_pooler=True, use_lscore=False)
    out_cos = jax.block_until_ready(
        scorer_cos.forward_separate(article_pool, summary_pool,
                                    summary_hid, input_ids, attn_mask))
    assert out_cos.shape == (B, 1)

    # --- separate path with l_score: fused cosine + l_score kernel ---
    # (a) multi-tile vocab stream with a padded tail tile
    scorer_sep = ScorerPallas(jax.random.PRNGKey(42), hidden_size=H, vocab_size=V,
                              separateEncode=True, use_pooler=True, use_lscore=True,
                              vocab_tile=128)
    out_sep = jax.block_until_ready(
        scorer_sep.forward_separate(article_pool, summary_pool,
                                    summary_hid, input_ids, attn_mask))
    assert out_sep.shape == (B, 1)

    # (b) default tile (512): single padded vocab tile
    scorer_sep2 = ScorerPallas(jax.random.PRNGKey(42), hidden_size=H, vocab_size=V,
                               separateEncode=True, use_pooler=True, use_lscore=True,
                               vocab_tile=512)
    out_sep2 = jax.block_until_ready(
        scorer_sep2.forward_separate(article_pool, summary_pool,
                                     summary_hid, input_ids, attn_mask))
    assert out_sep2.shape == (B, 1)

    # --- pure-JAX references (f32 end-to-end, as in the PyTorch module) ---
    ref_joint = jnp.sum(pooler_joint * scorer.fc_w, axis=-1, keepdims=True) + scorer.fc_b

    def _ref_cos(a, s):
        d = jnp.sum(a * s, axis=-1, keepdims=True)
        na = jnp.sqrt(jnp.sum(a * a, axis=-1, keepdims=True))
        ns = jnp.sqrt(jnp.sum(s * s, axis=-1, keepdims=True))
        return d / jnp.maximum(na * ns, 1e-8)

    ref_cos = _ref_cos(article_pool, summary_pool)

    z_ref = jax.nn.gelu(summary_hid.reshape(B * S, H) @ scorer_sep.w1 + scorer_sep.b1,
                        approximate=False)
    logits_ref = z_ref @ scorer_sep.w2 + scorer_sep.b2
    logp_ref = jax.nn.log_softmax(logits_ref, axis=-1)
    gathered = jnp.take_along_axis(logp_ref, input_ids.reshape(B * S, 1),
                                   axis=-1).reshape(B, S)
    num = jnp.sum(gathered, axis=-1, keepdims=True)
    den = jnp.sum(attn_mask, axis=-1, keepdims=True)
    ref_sep = ref_cos + (num / den + 200.0) / 100.0

    assert bool(jnp.all(jnp.isfinite(out_joint)))
    assert bool(jnp.all(jnp.isfinite(out_cos)))
    assert bool(jnp.all(jnp.isfinite(out_sep)))
    assert bool(jnp.all(jnp.isfinite(out_sep2)))
    assert jnp.allclose(out_joint, ref_joint, atol=5e-3, rtol=5e-3)
    assert jnp.allclose(out_cos, ref_cos, atol=5e-3, rtol=5e-3)
    # bf16-streamed W2/b2 + bf16 cached z vs f32 reference: small extra slack
    assert jnp.allclose(out_sep, ref_sep, atol=1e-2, rtol=1e-2)
    assert jnp.allclose(out_sep2, ref_sep, atol=1e-2, rtol=1e-2)

    print("KERNEL_OK")
</pallas_src>

<mosaic_0001>
module attributes {stable_mosaic.version = 11 : i64} {
  func.func @_fc_kernel(%arg0: i32, %arg1: memref<2x32xf32, #tpu.memory_space<vmem>>, %arg2: memref<1x32xf32, #tpu.memory_space<vmem>>, %arg3: memref<1x1xf32, #tpu.memory_space<vmem>>, %arg4: memref<2x128xf32, #tpu.memory_space<vmem>>) attributes {dimension_semantics = [#tpu.dimension_semantics<arbitrary>], iteration_bounds = array<i64: 1>, scalar_prefetch = 0 : i64, scratch_operands = 0 : i64, tpu.core_type = #tpu.core_type<tc>, window_params = [{pipeline_mode = #tpu.pipeline_mode<synchronous>, transform_indices = @transform_0, window_bounds = array<i64: 2, 32>}, {pipeline_mode = #tpu.pipeline_mode<synchronous>, transform_indices = @transform_1, window_bounds = array<i64: 1, 32>}, {pipeline_mode = #tpu.pipeline_mode<synchronous>, transform_indices = @transform_2, window_bounds = array<i64: 1, 1>}, {pipeline_mode = #tpu.pipeline_mode<synchronous>, transform_indices = @transform_3, window_bounds = array<i64: 2, 128>}]} {
    %c0 = arith.constant 0 : index
    %c0_0 = arith.constant 0 : index
    %0 = vector.load %arg1[%c0, %c0_0] : memref<2x32xf32, #tpu.memory_space<vmem>>, vector<2x32xf32>
    %c0_1 = arith.constant 0 : index
    %c0_2 = arith.constant 0 : index
    %1 = vector.load %arg2[%c0_1, %c0_2] : memref<1x32xf32, #tpu.memory_space<vmem>>, vector<1x32xf32>
    %2 = vector.broadcast %1 : vector<1x32xf32> to vector<2x32xf32>
    %3 = arith.mulf %0, %2 : vector<2x32xf32>
    %cst = arith.constant dense<0.000000e+00> : vector<2xf32>
    %4 = vector.multi_reduction <add>, %3, %cst [1] : vector<2x32xf32> to vector<2xf32>
    %5 = vector.shape_cast %4 : vector<2xf32> to vector<2x1xf32>
    %c0_3 = arith.constant 0 : index
    %c0_4 = arith.constant 0 : index
    %6 = vector.load %arg3[%c0_3, %c0_4] : memref<1x1xf32, #tpu.memory_space<vmem>>, vector<1x1xf32>
    %7 = vector.broadcast %6 : vector<1x1xf32> to vector<2x1xf32>
    %8 = arith.addf %5, %7 : vector<2x1xf32>
    %9 = vector.shape_cast %8 : vector<2x1xf32> to vector<2x1xf32>
    %10 = vector.broadcast %9 : vector<2x1xf32> to vector<2x128xf32>
    %c0_5 = arith.constant 0 : index
    %c0_6 = arith.constant 0 : index
    %11 = vector.load %arg4[%c0_5, %c0_6] : memref<2x128xf32, #tpu.memory_space<vmem>>, vector<2x128xf32>
    tpu.vector_store %arg4[%c0_5, %c0_6], %10 {strides = array<i32>} : memref<2x128xf32, #tpu.memory_space<vmem>>, vector<2x128xf32>,
    return
  }
  func.func @transform_0(%arg0: i32) -> (i32, i32) {
    %c0_i32 = arith.constant 0 : i32
    %c0_i32_0 = arith.constant 0 : i32
    %c0_i32_1 = arith.constant 0 : i32
    return %c0_i32, %c0_i32_0 : i32, i32
  }
  func.func @transform_1(%arg0: i32) -> (i32, i32) {
    %c0_i32 = arith.constant 0 : i32
    %c0_i32_0 = arith.constant 0 : i32
    %c0_i32_1 = arith.constant 0 : i32
    return %c0_i32, %c0_i32_0 : i32, i32
  }
  func.func @transform_2(%arg0: i32) -> (i32, i32) {
    %c0_i32 = arith.constant 0 : i32
    %c0_i32_0 = arith.constant 0 : i32
    %c0_i32_1 = arith.constant 0 : i32
    return %c0_i32, %c0_i32_0 : i32, i32
  }
  func.func @transform_3(%arg0: i32) -> (i32, i32) {
    %c0_i32 = arith.constant 0 : i32
    %c0_i32_0 = arith.constant 0 : i32
    %c0_i32_1 = arith.constant 0 : i32
    return %c0_i32, %c0_i32_0 : i32, i32
  }
}

</mosaic_0001>

<bundles_post_ra>
// kernel: tpu_custom_call.1
= control target key start
LH: loop header
LB: loop body
LE: loop exit
PB: predicated region body
PF: predicated region fallthrough
CT: control target
= control target key end

     0   :  { %s162_s0 = inlined_call_operand.vmem [shape: f32[2,32], index: 0, kind: input, shape index: {}]   ;;  %s163_s1 = inlined_call_operand.hbm [shape: f32[1,32], index: 1, kind: input, shape index: {}]   ;;  %s164_s2 = inlined_call_operand.<no memory space> [shape: f32[1,1], index: 2, kind: input, shape index: {}]   ;;  %s165_s3 = inlined_call_operand.hbm [shape: f32[2,128], index: 3, kind: output, shape index: {}]  }
   0x1   :  { %v8_v0 = vstv %s164_s2 }
   0x2   :  { %9 = vst [vmem:[#allocation2] sm:$0x1] %v8_v0 }
   0x3   :  { %10 = vsyncpa [#allocation4], 0 }
   0x4   :  { %11 = vsyncpa [#allocation5], 0  ;;  %s19_s16 = sshll.u32 %s163_s1, 4  ;;  %s127_s17 = smov [#allocation3]   ;;  %s20_s16 = int_to_ptr.hbm [resolvable:$true] %s19_s16 }
   0x5   :  { %s21_s18 = sshll.u32 %s127_s17, 4  ;;  %s22_s18 = int_to_ptr.vmem [resolvable:$true] %s21_s18 }
   0x6   :  { %24 = dma.hbm_to_vmem [thread:$0]  %s20_s16, 16, %s22_s18, [#allocation4]  }
   0x7   :  { %123 = dma.done.wait [#allocation4], 16  }
   0x8   :  { %124 = vsyncadd [#allocation4], 4294967280  ;;  %v31_v1 = vld [vmem:[%s162_s0] sm:$0x3]  ;;  %vm37_vm0 = vcmask 254976   ;;  %v128_v5 = vmov 0  }
   0x9   :  { %v73_v2 = vld [vmem:[#allocation3] ss:$0 sm:$0xff]  ;;  %72 = vset.pattern.permute.xlu0 %v128_v5  ;;  %v74_v6 = vld [vmem:[#allocation2] ss:$0 sm:$0xff]  ;;  %s129_s1 = smov [#allocation6]   ;;  %s59_s23 = sshll.u32 %s165_s3, 4  ;;  %s60_s23 = int_to_ptr.hbm [resolvable:$true] %s59_s23 }
   0xa   :  { %v36_v3 = vmul.f32 %v73_v2, %v31_v1  ;;  %s57_s2 = sshll.u32 %s129_s1, 4  ;;  %s58_s2 = int_to_ptr.vmem [resolvable:$true] %s57_s2 }
   0xc   :  { %v38_v4 = vsel %vm37_vm0, %v36_v3, 0.0 }
   0xd   :  { %39 = vadd.xlane.f32.xlu0 %v38_v4 }
  0x80   :  { %v40_v7 = vpop.xlane.xlu0 %39 }
  0x81   :  { %v45_v8 = vadd.f32 %v74_v6, %v40_v7 }
  0x83   :  { %48 = vperm.xlu0 %72, %v45_v8  }
  0xf5   :  { %v49_v9 = vpop.permute.xlu0 %48 }
  0xf6   :  { %51 = vst [vmem:[#allocation6] sm:$0x3] %v49_v9 }
  0xf7   :  { %62 = dma.vmem_to_hbm [thread:$0]  %s58_s2, 32, %s60_s23, [#allocation5]  }
  0xf8   :  { %125 = dma.done.wait [#allocation5], 32  }
  0xf9   :  { %126 = vsyncadd [#allocation5], 4294967264 }
  0xfa   :  { %67 = vsyncpa [#allocation4], 1 }
  0xfb   :  { %68 = vsyncpa [#allocation5], 1 }

</bundles_post_ra>
